<compile_context>
chip_gen: v7x
topology: tpu7x:2x2x1
jax: 0.10.0
libtpu: 0.0.40
codegen_flags: <defaults>
</compile_context>

<pallas_src>
import numpy as np
import jax
import jax.numpy as jnp
from jax import lax
from jax.experimental import pallas as pl
from jax.experimental.pallas import tpu as pltpu

# ---- static config (mirrors MultiGridNetwork.__init__) ----------------------
KERNEL_SIZE = 3                       # config.kernel_size
FC_DIRECTION = 32                     # config.fc_direction
N_ACTIONS = 7                         # n_actions
NUM_DIRECTIONS = 4
IMG_HW = 2 * (KERNEL_SIZE - 1) + 1    # spatial size must collapse to 1x1 (Linear(64,64))
CONV1_OUT = IMG_HW - KERNEL_SIZE + 1  # = 3
P = CONV1_OUT * CONV1_OUT             # 9 conv1 output positions
C_IN = 3
IN_FEAT = IMG_HW * IMG_HW * C_IN      # 75 (NHWC-flattened image row)
IN_PAD = 128                          # lane-dense input slab width
H1_FEAT = P * 32                      # 288 (folded conv1 output width)
OUT_PAD = 128                         # lane-dense output width (>= N_ACTIONS)
DEFAULT_BATCH_TILE = 1024


def _leaky(x):
    return jnp.where(x > 0, x, 0.01 * x)   # nn.LeakyReLU default slope


def _relu(x):
    return jnp.maximum(x, 0.0)


def _round_up(n, m):
    return ((n + m - 1) // m) * m


# ---- kernel ------------------------------------------------------------------
def _mgn_kernel(x_ref, d_ref, w1_ref, b1_ref, w2_ref, b2_ref,
                wi_ref, bi_ref, wh1i_ref, dhead_ref,
                wh2_ref, bh2_ref, wh3_ref, bh3_ref, out_ref):
    # conv1 folded to one matmul: (T,128) @ (128,288) + tiled bias, LeakyReLU
    h1 = _leaky(jnp.dot(x_ref[...], w1_ref[...],
                        preferred_element_type=jnp.float32) + b1_ref[...])

    # conv2 = full contraction over (pos, channel): (T,288) @ (288,64)
    y2 = _leaky(jnp.dot(h1, w2_ref[...],
                        preferred_element_type=jnp.float32) + b2_ref[...])

    # Flatten (already (T,64)) -> Linear(64,64) + LeakyReLU
    img = _leaky(jnp.dot(y2, wi_ref[...],
                         preferred_element_type=jnp.float32) + bi_ref[...])

    # direction branch + head-L1 bias, precomputed as a (4,192) table;
    # 4-way select on the VPU (no one-hot, no K=4 matmul).
    d = d_ref[...]                                             # (T,1) int32
    dsel = jnp.where(d == 0, dhead_ref[0:1, :], 0.0)
    for i in range(1, NUM_DIRECTIONS):
        dsel = dsel + jnp.where(d == i, dhead_ref[i:i + 1, :], 0.0)

    # head: concat([img, dir]) @ wh1 == img @ wh1[:64] + (dir @ wh1[64:] + bh1)
    h = _relu(jnp.dot(img, wh1i_ref[...],
                      preferred_element_type=jnp.float32) + dsel)
    h2 = _relu(jnp.dot(h, wh2_ref[...],
                       preferred_element_type=jnp.float32) + bh2_ref[...])
    out_ref[...] = (jnp.dot(h2, wh3_ref[...],
                            preferred_element_type=jnp.float32) + bh3_ref[...])


# ---- wrapper -----------------------------------------------------------------
def multigrid_forward(image_nhwc, directions, params, batch_tile=DEFAULT_BATCH_TILE):
    """image_nhwc: (B, 5, 5, 3) any numeric dtype; directions: (B,) ints in [0,4)."""
    (W1, b1, W2, b2, wi, bi, wd, bd, wh1, bh1, wh2, bh2, wh3, bh3) = params
    B = image_nhwc.shape[0]

    # process_image (NHWC->NCHW permute + float) is folded into the W1fold row
    # indexing: we flatten NHWC directly (h, w, c order) into a lane-dense slab.
    x = image_nhwc.astype(jnp.float32).reshape(B, IN_FEAT)
    x = jnp.pad(x, ((0, 0), (0, IN_PAD - IN_FEAT)))            # (B, 128)

    # Fold conv1 into a dense (IN_PAD, 288) weight (built once at trace time):
    # for output position p=(oi,oj), the 27x32 W1 block is scattered into the
    # rows of the flattened image that position reads; other rows are zero.
    k2 = KERNEL_SIZE * KERNEL_SIZE
    w1m_t = W1.reshape(32, C_IN * k2).T                        # (27,32), (c,kh,kw)-row order
    w1fold = jnp.zeros((IN_PAD, H1_FEAT), jnp.float32)
    for oi in range(CONV1_OUT):
        for oj in range(CONV1_OUT):
            p = oi * CONV1_OUT + oj
            rows = np.array([(oi + kh) * IMG_HW * C_IN + (oj + kw) * C_IN + c
                             for c in range(C_IN)
                             for kh in range(KERNEL_SIZE)
                             for kw in range(KERNEL_SIZE)], dtype=np.int32)
            w1fold = w1fold.at[rows, p * 32:(p + 1) * 32].set(w1m_t)
    b1fold = jnp.tile(b1, P).reshape(1, H1_FEAT)               # (1, 288)

    # conv2 as (288, 64): position-major / channel-minor, matching w1fold cols
    w2m = jnp.transpose(W2, (2, 3, 1, 0)).reshape(H1_FEAT, 64)

    # head: split wh1; fold the discrete direction branch + bh1 into a (4,192) table
    wh1i = wh1[:64, :]                                         # image half of head L1
    dhead = (_relu(wd + bd.reshape(1, -1)) @ wh1[64:, :]
             + bh1.reshape(1, -1))                             # (4, 192)

    # pad final layer to 128 output lanes (unmasked stores)
    wh3p = jnp.pad(wh3, ((0, 0), (0, OUT_PAD - N_ACTIONS)))
    bh3p = jnp.pad(bh3, ((0, OUT_PAD - N_ACTIONS),)).reshape(1, OUT_PAD)

    # batch padding / tiling: tile is a multiple of 8 rows, B padded to tile
    tile = min(batch_tile, _round_up(max(B, 1), 8))
    tile = _round_up(tile, 8)
    Bp = _round_up(B, tile)
    x = jnp.pad(x, ((0, Bp - B), (0, 0)))
    d = jnp.pad(directions.astype(jnp.int32), ((0, Bp - B),)).reshape(Bp, 1)

    args = (x, d, w1fold, b1fold, w2m, b2.reshape(1, -1),
            wi, bi.reshape(1, -1), wh1i, dhead,
            wh2, bh2.reshape(1, -1), wh3p, bh3p)

    def batch_spec(shape):
        return pl.BlockSpec((tile,) + shape[1:], lambda i: (i,) + (0,) * (len(shape) - 1))

    def const_spec(shape):
        return pl.BlockSpec(shape, lambda i: (0,) * len(shape))

    in_specs = [batch_spec(x.shape), batch_spec(d.shape)] + \
               [const_spec(a.shape) for a in args[2:]]

    n_weight_elems = sum(int(np.prod(a.shape)) for a in args[2:])
    flops = 2 * Bp * (IN_PAD * H1_FEAT + H1_FEAT * 64 + 64 * 64 + 64 * 192
                      + 192 * 64 + 64 * OUT_PAD)
    bytes_accessed = 4 * (Bp * (IN_PAD + OUT_PAD) + Bp + n_weight_elems)

    out = pl.pallas_call(
        _mgn_kernel,
        out_shape=jax.ShapeDtypeStruct((Bp, OUT_PAD), jnp.float32),
        grid_spec=pltpu.PrefetchScalarGridSpec(
            num_scalar_prefetch=0,
            grid=(Bp // tile,),
            in_specs=in_specs,
            out_specs=batch_spec((Bp, OUT_PAD)),
        ),
        compiler_params=pltpu.CompilerParams(
            dimension_semantics=("parallel",)),
        cost_estimate=pl.CostEstimate(flops=flops, transcendentals=0,
                                      bytes_accessed=bytes_accessed),
    )(*args)
    return out[:B, :N_ACTIONS]


# ---- pure-JAX reference (mirrors the PyTorch forward exactly) -----------------
def _reference(image_nhwc, directions, params):
    (W1, b1, W2, b2, wi, bi, wd, bd, wh1, bh1, wh2, bh2, wh3, bh3) = params
    B = image_nhwc.shape[0]
    x = jnp.transpose(image_nhwc.astype(jnp.float32), (0, 3, 1, 2))
    dn = ('NCHW', 'OIHW', 'NCHW')
    c1 = _leaky(lax.conv_general_dilated(x, W1, (1, 1), 'VALID',
                                         dimension_numbers=dn)
                + b1.reshape(1, -1, 1, 1))
    c2 = _leaky(lax.conv_general_dilated(c1, W2, (1, 1), 'VALID',
                                         dimension_numbers=dn)
                + b2.reshape(1, -1, 1, 1))
    img = _leaky(c2.reshape(B, 64) @ wi + bi)
    onehot = jax.nn.one_hot(directions.astype(jnp.int32), NUM_DIRECTIONS,
                            dtype=jnp.float32)
    dfe = _relu(onehot @ wd + bd)
    feat = jnp.concatenate([img, dfe], axis=-1)
    h = _relu(feat @ wh1 + bh1)
    h2 = _relu(h @ wh2 + bh2)
    return h2 @ wh3 + bh3


def _init_params(key):
    ks = jax.random.split(key, 14)
    s = 0.1
    W1 = s * jax.random.normal(ks[0], (32, 3, KERNEL_SIZE, KERNEL_SIZE), jnp.float32)
    b1 = s * jax.random.normal(ks[1], (32,), jnp.float32)
    W2 = s * jax.random.normal(ks[2], (64, 32, KERNEL_SIZE, KERNEL_SIZE), jnp.float32)
    b2 = s * jax.random.normal(ks[3], (64,), jnp.float32)
    wi = s * jax.random.normal(ks[4], (64, 64), jnp.float32)
    bi = s * jax.random.normal(ks[5], (64,), jnp.float32)
    wd = s * jax.random.normal(ks[6], (NUM_DIRECTIONS, FC_DIRECTION), jnp.float32)
    bd = s * jax.random.normal(ks[7], (FC_DIRECTION,), jnp.float32)
    wh1 = s * jax.random.normal(ks[8], (64 + FC_DIRECTION, 192), jnp.float32)
    bh1 = s * jax.random.normal(ks[9], (192,), jnp.float32)
    wh2 = s * jax.random.normal(ks[10], (192, 64), jnp.float32)
    bh2 = s * jax.random.normal(ks[11], (64,), jnp.float32)
    wh3 = s * jax.random.normal(ks[12], (64, N_ACTIONS), jnp.float32)
    bh3 = s * jax.random.normal(ks[13], (N_ACTIONS,), jnp.float32)
    return (W1, b1, W2, b2, wi, bi, wd, bd, wh1, bh1, wh2, bh2, wh3, bh3)


if __name__ == "__main__":
    key = jax.random.PRNGKey(0)
    k_img, k_dir, k_par = jax.random.split(key, 3)
    params = _init_params(k_par)

    # obs['image']: (B, 5, 5, 3) small integer grid values; obs['direction']: (B,)
    B = 2
    image = jax.random.randint(k_img, (B, IMG_HW, IMG_HW, 3), 0, 6, jnp.int32)
    direction = jax.random.randint(k_dir, (B,), 0, NUM_DIRECTIONS, jnp.int32)

    out = jax.block_until_ready(multigrid_forward(image, direction, params))
    ref = jax.block_until_ready(_reference(image, direction, params))
    assert out.shape == (B, N_ACTIONS)
    assert jnp.allclose(out, ref, atol=1e-4, rtol=1e-4), (out, ref)

    # exercise the batch grid (>1 tile) with a non-multiple-of-8 batch
    B2 = 37
    k_img2, k_dir2 = jax.random.split(k_img)
    image2 = jax.random.randint(k_img2, (B2, IMG_HW, IMG_HW, 3), 0, 6, jnp.int32)
    direction2 = jax.random.randint(k_dir2, (B2,), 0, NUM_DIRECTIONS, jnp.int32)
    out2 = jax.block_until_ready(
        multigrid_forward(image2, direction2, params, batch_tile=8))
    ref2 = jax.block_until_ready(_reference(image2, direction2, params))
    assert out2.shape == (B2, N_ACTIONS)
    assert jnp.allclose(out2, ref2, atol=1e-4, rtol=1e-4), (out2, ref2)

    # TODO(synk): the PyTorch list-of-obs recursion / dict unpacking is host-side
    # glue and is intentionally handled outside the kernel.
    print("KERNEL_OK")
</pallas_src>

<mosaic_0001>
module attributes {stable_mosaic.version = 11 : i64} {
  func.func @_mgn_kernel(%arg0: i32, %arg1: memref<8x128xf32, #tpu.memory_space<vmem>>, %arg2: memref<8x1xi32, #tpu.memory_space<vmem>>, %arg3: memref<128x288xf32, #tpu.memory_space<vmem>>, %arg4: memref<1x288xf32, #tpu.memory_space<vmem>>, %arg5: memref<288x64xf32, #tpu.memory_space<vmem>>, %arg6: memref<1x64xf32, #tpu.memory_space<vmem>>, %arg7: memref<64x64xf32, #tpu.memory_space<vmem>>, %arg8: memref<1x64xf32, #tpu.memory_space<vmem>>, %arg9: memref<64x192xf32, #tpu.memory_space<vmem>>, %arg10: memref<4x192xf32, #tpu.memory_space<vmem>>, %arg11: memref<192x64xf32, #tpu.memory_space<vmem>>, %arg12: memref<1x64xf32, #tpu.memory_space<vmem>>, %arg13: memref<64x128xf32, #tpu.memory_space<vmem>>, %arg14: memref<1x128xf32, #tpu.memory_space<vmem>>, %arg15: memref<8x128xf32, #tpu.memory_space<vmem>>) attributes {dimension_semantics = [#tpu.dimension_semantics<parallel>], iteration_bounds = array<i64: 1>, scalar_prefetch = 0 : i64, scratch_operands = 0 : i64, tpu.core_type = #tpu.core_type<tc>, window_params = [{transform_indices = @transform_0, window_bounds = array<i64: 8, 128>}, {transform_indices = @transform_1, window_bounds = array<i64: 8, 1>}, {pipeline_mode = #tpu.pipeline_mode<synchronous>, transform_indices = @transform_2, window_bounds = array<i64: 128, 288>}, {pipeline_mode = #tpu.pipeline_mode<synchronous>, transform_indices = @transform_3, window_bounds = array<i64: 1, 288>}, {pipeline_mode = #tpu.pipeline_mode<synchronous>, transform_indices = @transform_4, window_bounds = array<i64: 288, 64>}, {pipeline_mode = #tpu.pipeline_mode<synchronous>, transform_indices = @transform_5, window_bounds = array<i64: 1, 64>}, {pipeline_mode = #tpu.pipeline_mode<synchronous>, transform_indices = @transform_6, window_bounds = array<i64: 64, 64>}, {pipeline_mode = #tpu.pipeline_mode<synchronous>, transform_indices = @transform_7, window_bounds = array<i64: 1, 64>}, {pipeline_mode = #tpu.pipeline_mode<synchronous>, transform_indices = @transform_8, window_bounds = array<i64: 64, 192>}, {pipeline_mode = #tpu.pipeline_mode<synchronous>, transform_indices = @transform_9, window_bounds = array<i64: 4, 192>}, {pipeline_mode = #tpu.pipeline_mode<synchronous>, transform_indices = @transform_10, window_bounds = array<i64: 192, 64>}, {pipeline_mode = #tpu.pipeline_mode<synchronous>, transform_indices = @transform_11, window_bounds = array<i64: 1, 64>}, {pipeline_mode = #tpu.pipeline_mode<synchronous>, transform_indices = @transform_12, window_bounds = array<i64: 64, 128>}, {pipeline_mode = #tpu.pipeline_mode<synchronous>, transform_indices = @transform_13, window_bounds = array<i64: 1, 128>}, {transform_indices = @transform_14, window_bounds = array<i64: 8, 128>}]} {
    %c0 = arith.constant 0 : index
    %c0_0 = arith.constant 0 : index
    %0 = vector.load %arg1[%c0, %c0_0] : memref<8x128xf32, #tpu.memory_space<vmem>>, vector<8x128xf32>
    %c0_1 = arith.constant 0 : index
    %c0_2 = arith.constant 0 : index
    %1 = vector.load %arg3[%c0_1, %c0_2] : memref<128x288xf32, #tpu.memory_space<vmem>>, vector<128x288xf32>
    %cst = arith.constant dense<0.000000e+00> : vector<8x288xf32>
    %2 = tpu.matmul %0, %1, %cst {dimension_numbers = #tpu.dot_dimension_numbers<[1], [0], [0], [1], [0, 0, 1, 1], [], []>} : vector<8x128xf32>, vector<128x288xf32>, vector<8x288xf32> -> vector<8x288xf32>
    %c0_3 = arith.constant 0 : index
    %c0_4 = arith.constant 0 : index
    %3 = vector.load %arg4[%c0_3, %c0_4] : memref<1x288xf32, #tpu.memory_space<vmem>>, vector<1x288xf32>
    %4 = vector.broadcast %3 : vector<1x288xf32> to vector<8x288xf32>
    %5 = arith.addf %2, %4 : vector<8x288xf32>
    %cst_5 = arith.constant 0.000000e+00 : f32
    %6 = vector.broadcast %cst_5 : f32 to vector<8x288xf32>
    %7 = arith.cmpf ogt, %5, %6 : vector<8x288xf32>
    %cst_6 = arith.constant 0.00999999977 : f32
    %8 = vector.broadcast %cst_6 : f32 to vector<8x288xf32>
    %9 = arith.mulf %8, %5 : vector<8x288xf32>
    %10 = arith.select %7, %5, %9 : vector<8x288xi1>, vector<8x288xf32>
    %c0_7 = arith.constant 0 : index
    %c0_8 = arith.constant 0 : index
    %11 = vector.load %arg5[%c0_7, %c0_8] : memref<288x64xf32, #tpu.memory_space<vmem>>, vector<288x64xf32>
    %cst_9 = arith.constant dense<0.000000e+00> : vector<8x64xf32>
    %12 = tpu.matmul %10, %11, %cst_9 {dimension_numbers = #tpu.dot_dimension_numbers<[1], [0], [0], [1], [0, 0, 1, 1], [], []>} : vector<8x288xf32>, vector<288x64xf32>, vector<8x64xf32> -> vector<8x64xf32>
    %c0_10 = arith.constant 0 : index
    %c0_11 = arith.constant 0 : index
    %13 = vector.load %arg6[%c0_10, %c0_11] : memref<1x64xf32, #tpu.memory_space<vmem>>, vector<1x64xf32>
    %14 = vector.broadcast %13 : vector<1x64xf32> to vector<8x64xf32>
    %15 = arith.addf %12, %14 : vector<8x64xf32>
    %cst_12 = arith.constant 0.000000e+00 : f32
    %16 = vector.broadcast %cst_12 : f32 to vector<8x64xf32>
    %17 = arith.cmpf ogt, %15, %16 : vector<8x64xf32>
    %cst_13 = arith.constant 0.00999999977 : f32
    %18 = vector.broadcast %cst_13 : f32 to vector<8x64xf32>
    %19 = arith.mulf %18, %15 : vector<8x64xf32>
    %20 = arith.select %17, %15, %19 : vector<8x64xi1>, vector<8x64xf32>
    %c0_14 = arith.constant 0 : index
    %c0_15 = arith.constant 0 : index
    %21 = vector.load %arg7[%c0_14, %c0_15] : memref<64x64xf32, #tpu.memory_space<vmem>>, vector<64x64xf32>
    %cst_16 = arith.constant dense<0.000000e+00> : vector<8x64xf32>
    %22 = tpu.matmul %20, %21, %cst_16 {dimension_numbers = #tpu.dot_dimension_numbers<[1], [0], [0], [1], [0, 0, 1, 1], [], []>} : vector<8x64xf32>, vector<64x64xf32>, vector<8x64xf32> -> vector<8x64xf32>
    %c0_17 = arith.constant 0 : index
    %c0_18 = arith.constant 0 : index
    %23 = vector.load %arg8[%c0_17, %c0_18] : memref<1x64xf32, #tpu.memory_space<vmem>>, vector<1x64xf32>
    %24 = vector.broadcast %23 : vector<1x64xf32> to vector<8x64xf32>
    %25 = arith.addf %22, %24 : vector<8x64xf32>
    %cst_19 = arith.constant 0.000000e+00 : f32
    %26 = vector.broadcast %cst_19 : f32 to vector<8x64xf32>
    %27 = arith.cmpf ogt, %25, %26 : vector<8x64xf32>
    %cst_20 = arith.constant 0.00999999977 : f32
    %28 = vector.broadcast %cst_20 : f32 to vector<8x64xf32>
    %29 = arith.mulf %28, %25 : vector<8x64xf32>
    %30 = arith.select %27, %25, %29 : vector<8x64xi1>, vector<8x64xf32>
    %c0_21 = arith.constant 0 : index
    %c0_22 = arith.constant 0 : index
    %31 = vector.load %arg2[%c0_21, %c0_22] : memref<8x1xi32, #tpu.memory_space<vmem>>, vector<8x1xi32>
    %c0_i32 = arith.constant 0 : i32
    %32 = vector.broadcast %c0_i32 : i32 to vector<8x1xi32>
    %33 = arith.cmpi eq, %31, %32 : vector<8x1xi32>
    %c0_23 = arith.constant 0 : index
    %c0_24 = arith.constant 0 : index
    %34 = vector.load %arg10[%c0_23, %c0_24] : memref<4x192xf32, #tpu.memory_space<vmem>>, vector<1x192xf32>
    %cst_25 = arith.constant 0.000000e+00 : f32
    %35 = vector.shape_cast %33 : vector<8x1xi1> to vector<8x1xi1>
    %36 = vector.broadcast %35 : vector<8x1xi1> to vector<8x192xi1>
    %37 = vector.shape_cast %34 : vector<1x192xf32> to vector<1x192xf32>
    %38 = vector.broadcast %37 : vector<1x192xf32> to vector<8x192xf32>
    %39 = vector.broadcast %cst_25 : f32 to vector<8x192xf32>
    %40 = arith.select %36, %38, %39 : vector<8x192xi1>, vector<8x192xf32>
    %c1_i32 = arith.constant 1 : i32
    %41 = vector.broadcast %c1_i32 : i32 to vector<8x1xi32>
    %42 = arith.cmpi eq, %31, %41 : vector<8x1xi32>
    %c1 = arith.constant 1 : index
    %c0_26 = arith.constant 0 : index
    %43 = vector.load %arg10[%c1, %c0_26] : memref<4x192xf32, #tpu.memory_space<vmem>>, vector<1x192xf32>
    %cst_27 = arith.constant 0.000000e+00 : f32
    %44 = vector.shape_cast %42 : vector<8x1xi1> to vector<8x1xi1>
    %45 = vector.broadcast %44 : vector<8x1xi1> to vector<8x192xi1>
    %46 = vector.shape_cast %43 : vector<1x192xf32> to vector<1x192xf32>
    %47 = vector.broadcast %46 : vector<1x192xf32> to vector<8x192xf32>
    %48 = vector.broadcast %cst_27 : f32 to vector<8x192xf32>
    %49 = arith.select %45, %47, %48 : vector<8x192xi1>, vector<8x192xf32>
    %50 = arith.addf %40, %49 : vector<8x192xf32>
    %c2_i32 = arith.constant 2 : i32
    %51 = vector.broadcast %c2_i32 : i32 to vector<8x1xi32>
    %52 = arith.cmpi eq, %31, %51 : vector<8x1xi32>
    %c2 = arith.constant 2 : index
    %c0_28 = arith.constant 0 : index
    %53 = vector.load %arg10[%c2, %c0_28] : memref<4x192xf32, #tpu.memory_space<vmem>>, vector<1x192xf32>
    %cst_29 = arith.constant 0.000000e+00 : f32
    %54 = vector.shape_cast %52 : vector<8x1xi1> to vector<8x1xi1>
    %55 = vector.broadcast %54 : vector<8x1xi1> to vector<8x192xi1>
    %56 = vector.shape_cast %53 : vector<1x192xf32> to vector<1x192xf32>
    %57 = vector.broadcast %56 : vector<1x192xf32> to vector<8x192xf32>
    %58 = vector.broadcast %cst_29 : f32 to vector<8x192xf32>
    %59 = arith.select %55, %57, %58 : vector<8x192xi1>, vector<8x192xf32>
    %60 = arith.addf %50, %59 : vector<8x192xf32>
    %c3_i32 = arith.constant 3 : i32
    %61 = vector.broadcast %c3_i32 : i32 to vector<8x1xi32>
    %62 = arith.cmpi eq, %31, %61 : vector<8x1xi32>
    %c3 = arith.constant 3 : index
    %c0_30 = arith.constant 0 : index
    %63 = vector.load %arg10[%c3, %c0_30] : memref<4x192xf32, #tpu.memory_space<vmem>>, vector<1x192xf32>
    %cst_31 = arith.constant 0.000000e+00 : f32
    %64 = vector.shape_cast %62 : vector<8x1xi1> to vector<8x1xi1>
    %65 = vector.broadcast %64 : vector<8x1xi1> to vector<8x192xi1>
    %66 = vector.shape_cast %63 : vector<1x192xf32> to vector<1x192xf32>
    %67 = vector.broadcast %66 : vector<1x192xf32> to vector<8x192xf32>
    %68 = vector.broadcast %cst_31 : f32 to vector<8x192xf32>
    %69 = arith.select %65, %67, %68 : vector<8x192xi1>, vector<8x192xf32>
    %70 = arith.addf %60, %69 : vector<8x192xf32>
    %c0_32 = arith.constant 0 : index
    %c0_33 = arith.constant 0 : index
    %71 = vector.load %arg9[%c0_32, %c0_33] : memref<64x192xf32, #tpu.memory_space<vmem>>, vector<64x192xf32>
    %cst_34 = arith.constant dense<0.000000e+00> : vector<8x192xf32>
    %72 = tpu.matmul %30, %71, %cst_34 {dimension_numbers = #tpu.dot_dimension_numbers<[1], [0], [0], [1], [0, 0, 1, 1], [], []>} : vector<8x64xf32>, vector<64x192xf32>, vector<8x192xf32> -> vector<8x192xf32>
    %73 = arith.addf %72, %70 : vector<8x192xf32>
    %cst_35 = arith.constant 0.000000e+00 : f32
    %74 = vector.broadcast %cst_35 : f32 to vector<8x192xf32>
    %75 = arith.maximumf %73, %74 : vector<8x192xf32>
    %c0_36 = arith.constant 0 : index
    %c0_37 = arith.constant 0 : index
    %76 = vector.load %arg11[%c0_36, %c0_37] : memref<192x64xf32, #tpu.memory_space<vmem>>, vector<192x64xf32>
    %cst_38 = arith.constant dense<0.000000e+00> : vector<8x64xf32>
    %77 = tpu.matmul %75, %76, %cst_38 {dimension_numbers = #tpu.dot_dimension_numbers<[1], [0], [0], [1], [0, 0, 1, 1], [], []>} : vector<8x192xf32>, vector<192x64xf32>, vector<8x64xf32> -> vector<8x64xf32>
    %c0_39 = arith.constant 0 : index
    %c0_40 = arith.constant 0 : index
    %78 = vector.load %arg12[%c0_39, %c0_40] : memref<1x64xf32, #tpu.memory_space<vmem>>, vector<1x64xf32>
    %79 = vector.broadcast %78 : vector<1x64xf32> to vector<8x64xf32>
    %80 = arith.addf %77, %79 : vector<8x64xf32>
    %cst_41 = arith.constant 0.000000e+00 : f32
    %81 = vector.broadcast %cst_41 : f32 to vector<8x64xf32>
    %82 = arith.maximumf %80, %81 : vector<8x64xf32>
    %c0_42 = arith.constant 0 : index
    %c0_43 = arith.constant 0 : index
    %83 = vector.load %arg13[%c0_42, %c0_43] : memref<64x128xf32, #tpu.memory_space<vmem>>, vector<64x128xf32>
    %cst_44 = arith.constant dense<0.000000e+00> : vector<8x128xf32>
    %84 = tpu.matmul %82, %83, %cst_44 {dimension_numbers = #tpu.dot_dimension_numbers<[1], [0], [0], [1], [0, 0, 1, 1], [], []>} : vector<8x64xf32>, vector<64x128xf32>, vector<8x128xf32> -> vector<8x128xf32>
    %c0_45 = arith.constant 0 : index
    %c0_46 = arith.constant 0 : index
    %85 = vector.load %arg14[%c0_45, %c0_46] : memref<1x128xf32, #tpu.memory_space<vmem>>, vector<1x128xf32>
    %86 = vector.broadcast %85 : vector<1x128xf32> to vector<8x128xf32>
    %87 = arith.addf %84, %86 : vector<8x128xf32>
    %c0_47 = arith.constant 0 : index
    %c0_48 = arith.constant 0 : index
    %88 = vector.load %arg15[%c0_47, %c0_48] : memref<8x128xf32, #tpu.memory_space<vmem>>, vector<8x128xf32>
    tpu.vector_store %arg15[%c0_47, %c0_48], %87 {strides = array<i32>} : memref<8x128xf32, #tpu.memory_space<vmem>>, vector<8x128xf32>,
    return
  }
  func.func @transform_0(%arg0: i32) -> (i32, i32) {
    %c0_i32 = arith.constant 0 : i32
    %c0_i32_0 = arith.constant 0 : i32
    return %arg0, %c0_i32 : i32, i32
  }
  func.func @transform_1(%arg0: i32) -> (i32, i32) {
    %c0_i32 = arith.constant 0 : i32
    %c0_i32_0 = arith.constant 0 : i32
    return %arg0, %c0_i32 : i32, i32
  }
  func.func @transform_2(%arg0: i32) -> (i32, i32) {
    %c0_i32 = arith.constant 0 : i32
    %c0_i32_0 = arith.constant 0 : i32
    %c0_i32_1 = arith.constant 0 : i32
    return %c0_i32, %c0_i32_0 : i32, i32
  }
  func.func @transform_3(%arg0: i32) -> (i32, i32) {
    %c0_i32 = arith.constant 0 : i32
    %c0_i32_0 = arith.constant 0 : i32
    %c0_i32_1 = arith.constant 0 : i32
    return %c0_i32, %c0_i32_0 : i32, i32
  }
  func.func @transform_4(%arg0: i32) -> (i32, i32) {
    %c0_i32 = arith.constant 0 : i32
    %c0_i32_0 = arith.constant 0 : i32
    %c0_i32_1 = arith.constant 0 : i32
    return %c0_i32, %c0_i32_0 : i32, i32
  }
  func.func @transform_5(%arg0: i32) -> (i32, i32) {
    %c0_i32 = arith.constant 0 : i32
    %c0_i32_0 = arith.constant 0 : i32
    %c0_i32_1 = arith.constant 0 : i32
    return %c0_i32, %c0_i32_0 : i32, i32
  }
  func.func @transform_6(%arg0: i32) -> (i32, i32) {
    %c0_i32 = arith.constant 0 : i32
    %c0_i32_0 = arith.constant 0 : i32
    %c0_i32_1 = arith.constant 0 : i32
    return %c0_i32, %c0_i32_0 : i32, i32
  }
  func.func @transform_7(%arg0: i32) -> (i32, i32) {
    %c0_i32 = arith.constant 0 : i32
    %c0_i32_0 = arith.constant 0 : i32
    %c0_i32_1 = arith.constant 0 : i32
    return %c0_i32, %c0_i32_0 : i32, i32
  }
  func.func @transform_8(%arg0: i32) -> (i32, i32) {
    %c0_i32 = arith.constant 0 : i32
    %c0_i32_0 = arith.constant 0 : i32
    %c0_i32_1 = arith.constant 0 : i32
    return %c0_i32, %c0_i32_0 : i32, i32
  }
  func.func @transform_9(%arg0: i32) -> (i32, i32) {
    %c0_i32 = arith.constant 0 : i32
    %c0_i32_0 = arith.constant 0 : i32
    %c0_i32_1 = arith.constant 0 : i32
    return %c0_i32, %c0_i32_0 : i32, i32
  }
  func.func @transform_10(%arg0: i32) -> (i32, i32) {
    %c0_i32 = arith.constant 0 : i32
    %c0_i32_0 = arith.constant 0 : i32
    %c0_i32_1 = arith.constant 0 : i32
    return %c0_i32, %c0_i32_0 : i32, i32
  }
  func.func @transform_11(%arg0: i32) -> (i32, i32) {
    %c0_i32 = arith.constant 0 : i32
    %c0_i32_0 = arith.constant 0 : i32
    %c0_i32_1 = arith.constant 0 : i32
    return %c0_i32, %c0_i32_0 : i32, i32
  }
  func.func @transform_12(%arg0: i32) -> (i32, i32) {
    %c0_i32 = arith.constant 0 : i32
    %c0_i32_0 = arith.constant 0 : i32
    %c0_i32_1 = arith.constant 0 : i32
    return %c0_i32, %c0_i32_0 : i32, i32
  }
  func.func @transform_13(%arg0: i32) -> (i32, i32) {
    %c0_i32 = arith.constant 0 : i32
    %c0_i32_0 = arith.constant 0 : i32
    %c0_i32_1 = arith.constant 0 : i32
    return %c0_i32, %c0_i32_0 : i32, i32
  }
  func.func @transform_14(%arg0: i32) -> (i32, i32) {
    %c0_i32 = arith.constant 0 : i32
    %c0_i32_0 = arith.constant 0 : i32
    return %arg0, %c0_i32 : i32, i32
  }
}

</mosaic_0001>

<bundles_post_ra>
// kernel: tpu_custom_call.1
= control target key start
LH: loop header
LB: loop body
LE: loop exit
PB: predicated region body
PF: predicated region fallthrough
CT: control target
= control target key end

     0   :  { %v1308_v7 = vmov 0.0|0.0   ;;  %v1309_v8 = vmov 0.0   ;;  %vm1310_vm0 = vmmov 0   ;;  %s1911_s0 = inlined_call_operand.vmem [shape: f32[8,128], index: 0, kind: input, shape index: {}]   ;;  %s1912_s1 = inlined_call_operand.vmem [shape: s32[8,1], index: 1, kind: input, shape index: {}]   ;;  %s1913_s2 = inlined_call_operand.vmem [shape: f32[128,288], index: 2, kind: input, shape index: {}]   ;;  %s1914_s3 = inlined_call_operand.vmem [shape: f32[1,288], index: 3, kind: input, shape index: {}]   ;;  %s1915_s4 = inlined_call_operand.vmem [shape: f32[288,64], index: 4, kind: input, shape index: {}]   ;;  %s1916_s5 = inlined_call_operand.vmem [shape: f32[1,64], index: 5, kind: input, shape index: {}]   ;;  %s1917_s6 = inlined_call_operand.vmem [shape: f32[64,64], index: 6, kind: input, shape index: {}]   ;;  %s1918_s7 = inlined_call_operand.vmem [shape: f32[1,64], index: 7, kind: input, shape index: {}]   ;;  %s1919_s8 = inlined_call_operand.vmem [shape: f32[64,192], index: 8, kind: input, shape index: {}]   ;;  %s1920_s9 = inlined_call_operand.vmem [shape: f32[4,192], index: 9, kind: input, shape index: {}]   ;;  %s1921_s10 = inlined_call_operand.vmem [shape: f32[192,64], index: 10, kind: input, shape index: {}]   ;;  %s1922_s11 = inlined_call_operand.vmem [shape: f32[1,64], index: 11, kind: input, shape index: {}]   ;;  %s1923_s12 = inlined_call_operand.vmem [shape: f32[64,128], index: 12, kind: input, shape index: {}]   ;;  %s1924_s13 = inlined_call_operand.vmem [shape: f32[1,128], index: 13, kind: input, shape index: {}]   ;;  %s1925_s14 = inlined_call_operand.hbm [shape: f32[8,128], index: 14, kind: output, shape index: {}]  }
   0x1   :  { %v50_v0 = vld [vmem:[%s1913_s2 + $0x8] sm:$0xff]  ;;  %v53_v1 = vld [vmem:[%s1913_s2 + $0x20] sm:$0xff]  ;;  %v52_v4 = vld [vmem:[%s1913_s2 + $0x18] sm:$0xff]  ;;  %1139 = vmatprep.subr.bf16.mxu1 %v1308_v7  ;;  %178 = vmatprep.mubr.f32.mxu0 %v1309_v8 }
   0x2   :  { %v49_v2 = vld [vmem:[%s1913_s2] sm:$0xff]  ;;  %v1107_v3 = vpack.c.bf16 %v53_v1, %v50_v0  ;;  %v56_v5 = vld [vmem:[%s1913_s2 + $0x38] sm:$0xff]  ;;  %v59_v6 = vld [vmem:[%s1913_s2 + $0x50] sm:$0xff]  ;;  %1055 = vmatprep.mubr.msk.f32.mxu1 %vm1310_vm0, %v1309_v8 }
   0x3   :  { %v1109_v9 = vpack.c.bf16 %v52_v4, %v49_v2  ;;  %v1111_v10 = vpack.c.bf16 %v59_v6, %v56_v5  ;;  %v55_v11 = vld [vmem:[%s1913_s2 + $0x30] sm:$0xff]  ;;  %v58_v12 = vld [vmem:[%s1913_s2 + $0x48] sm:$0xff]  ;;  %v65_v16 = vld [vmem:[%s1913_s2 + $0x80] sm:$0xff] }
   0x4   :  { %v51_v13 = vld [vmem:[%s1913_s2 + $0x10] sm:$0xff]  ;;  %1108 = vmatprep.subr.bf16.mxu0 %v1107_v3  ;;  %v54_v14 = vld [vmem:[%s1913_s2 + $0x28] sm:$0xff]  ;;  %v1113_v17 = vpack.c.bf16 %v58_v12, %v55_v11  ;;  %v57_v19 = vld [vmem:[%s1913_s2 + $0x40] sm:$0xff] }
   0x5   :  { %v62_v15 = vld [vmem:[%s1913_s2 + $0x68] sm:$0xff]  ;;  %1110 = vmatpush1.bf16.msra.mxu0 %v1109_v9  ;;  %v1140_v18 = vpack.c.bf16 %v54_v14, %v51_v13  ;;  %v61_v21 = vld [vmem:[%s1913_s2 + $0x60] sm:$0xff]  ;;  %v64_v22 = vld [vmem:[%s1913_s2 + $0x78] sm:$0xff] }
   0x6   :  { %1112 = vmatprep.subr.bf16.mxu0 %v1111_v10  ;;  %v1115_v20 = vpack.c.bf16 %v65_v16, %v62_v15  ;;  %v60_v23 = vld [vmem:[%s1913_s2 + $0x58] sm:$0xff]  ;;  %v71_v26 = vld [vmem:[%s1913_s2 + $0xb0] sm:$0xff]  ;;  %v66_v28 = vld [vmem:[%s1913_s2 + $0x88] sm:$0xff]  ;;  %v1117_v29 = vpack.c.bf16 %v64_v22, %v61_v21 }
   0x7   :  { %1141 = vmatpush3.bf16.msra.mxu1 %v1140_v18  ;;  %v1143_v24 = vpack.c.bf16 %v60_v23, %v57_v19  ;;  %v68_v25 = vld [vmem:[%s1913_s2 + $0x98] sm:$0xff]  ;;  %v63_v27 = vld [vmem:[%s1913_s2 + $0x70] sm:$0xff]  ;;  %v70_v32 = vld [vmem:[%s1913_s2 + $0xa8] sm:$0xff] }
   0x8   :  { %1142 = vmatprep.subr.bf16.mxu1 %v1308_v7  ;;  %v1119_v30 = vpack.c.bf16 %v71_v26, %v68_v25  ;;  %v67_v31 = vld [vmem:[%s1913_s2 + $0x90] sm:$0xff]  ;;  %v1146_v33 = vpack.c.bf16 %v66_v28, %v63_v27  ;;  %v74_v34 = vld [vmem:[%s1913_s2 + $0xc8] sm:$0xff]  ;;  %v77_v35 = vld [vmem:[%s1913_s2 + $0xe0] sm:$0xff] }
   0x9   :  { %1114 = vmatpush1.bf16.msra.mxu0 %v1113_v17  ;;  %v69_v36 = vld [vmem:[%s1913_s2 + $0xa0] sm:$0xff]  ;;  %v72_v37 = vld [vmem:[%s1913_s2 + $0xb8] sm:$0xff]  ;;  %v1121_v38 = vpack.c.bf16 %v70_v32, %v67_v31  ;;  %v1123_v39 = vpack.c.bf16 %v77_v35, %v74_v34  ;;  %v83_v44 = vld [vmem:[%s1913_s2 + $0x110] sm:$0xff] }
   0xa   :  { %1116 = vmatprep.subr.bf16.mxu0 %v1115_v20  ;;  %v73_v40 = vld [vmem:[%s1913_s2 + $0xc0] sm:$0xff]  ;;  %v76_v41 = vld [vmem:[%s1913_s2 + $0xd8] sm:$0xff]  ;;  %v1149_v42 = vpack.c.bf16 %v72_v37, %v69_v36  ;;  %v75_v45 = vld [vmem:[%s1913_s2 + $0xd0] sm:$0xff] }
   0xb   :  { %1144 = vmatpush3.bf16.msra.mxu1 %v1143_v24  ;;  %v80_v43 = vld [vmem:[%s1913_s2 + $0xf8] sm:$0xff]  ;;  %v78_v46 = vld [vmem:[%s1913_s2 + $0xe8] sm:$0xff]  ;;  %v1125_v47 = vpack.c.bf16 %v76_v41, %v73_v40  ;;  %v79_v49 = vld [vmem:[%s1913_s2 + $0xf0] sm:$0xff] }
   0xc   :  { %1145 = vmatprep.subr.bf16.mxu1 %v1308_v7  ;;  %v1127_v48 = vpack.c.bf16 %v83_v44, %v80_v43  ;;  %v82_v50 = vld [vmem:[%s1913_s2 + $0x108] sm:$0xff]  ;;  %v1152_v51 = vpack.c.bf16 %v78_v46, %v75_v45  ;;  %v89_v53 = vld [vmem:[%s1913_s2 + $0x140] sm:$0xff]  ;;  %v84_v55 = vld [vmem:[%s1913_s2 + $0x118] sm:$0xff] }
   0xd   :  { %1118 = vmatpush1.bf16.msra.mxu0 %v1117_v29  ;;  %v86_v52 = vld [vmem:[%s1913_s2 + $0x128] sm:$0xff]  ;;  %v81_v54 = vld [vmem:[%s1913_s2 + $0x100] sm:$0xff]  ;;  %v1129_v56 = vpack.c.bf16 %v82_v50, %v79_v49  ;;  %v88_v59 = vld [vmem:[%s1913_s2 + $0x138] sm:$0xff] }
   0xe   :  { %1120 = vmatprep.subr.bf16.mxu0 %v1119_v30  ;;  %v1131_v57 = vpack.c.bf16 %v89_v53, %v86_v52  ;;  %v85_v58 = vld [vmem:[%s1913_s2 + $0x120] sm:$0xff]  ;;  %v1155_v60 = vpack.c.bf16 %v84_v55, %v81_v54  ;;  %v92_v61 = vld [vmem:[%s1913_s2 + $0x158] sm:$0xff]  ;;  %v95_v62 = vld [vmem:[%s1913_s2 + $0x170] sm:$0xff] }
   0xf   :  { %1147 = vmatpush3.bf16.msra.mxu1 %v1146_v33  ;;  %v87_v63 = vld [vmem:[%s1913_s2 + $0x130] sm:$0xff]  ;;  %v90_v0 = vld [vmem:[%s1913_s2 + $0x148] sm:$0xff]  ;;  %v1133_v1 = vpack.c.bf16 %v88_v59, %v85_v58 }
  0x10   :  { %1148 = vmatprep.subr.bf16.mxu1 %v1308_v7 }
  0x11   :  { %1122 = vmatpush1.bf16.msra.mxu0 %v1121_v38 }
  0x12   :  { %1124 = vmatprep.subr.bf16.mxu0 %v1123_v39 }
  0x13   :  { %1150 = vmatpush3.bf16.msra.mxu1 %v1149_v42 }
  0x14   :  { %1151 = vmatprep.subr.bf16.mxu1 %v1308_v7 }
  0x15   :  { %1126 = vmatpush1.bf16.msra.mxu0 %v1125_v47 }
  0x16   :  { %1128 = vmatprep.subr.bf16.mxu0 %v1127_v48 }
  0x17   :  { %1153 = vmatpush3.bf16.msra.mxu1 %v1152_v51 }
  0x18   :  { %1154 = vmatprep.subr.bf16.mxu1 %v1308_v7 }
  0x19   :  { %1130 = vmatpush1.bf16.msra.mxu0 %v1129_v56 }
  0x1a   :  { %19 = vsyncpa [#allocation3], 0  ;;  %1132 = vmatprep.subr.bf16.mxu0 %v1131_v57  ;;  %v1135_v2 = vpack.c.bf16 %v95_v62, %v92_v61  ;;  %v91_v3 = vld [vmem:[%s1913_s2 + $0x150] sm:$0xff]  ;;  %v94_v4 = vld [vmem:[%s1913_s2 + $0x168] sm:$0xff]  ;;  %v1158_v5 = vpack.c.bf16 %v90_v0, %v87_v63  ;;  %vm307_vm4 = vcmask 261120   ;;  %vm469_vm6 = vcmask 523264  }
  0x1b   :  { %1156 = vmatpush3.bf16.msra.mxu1 %v1155_v60  ;;  %v280_v6 = vld [vmem:[%s1915_s4 + $0x80] sm:$0xff]  ;;  %v281_v9 = vld [vmem:[%s1915_s4 + $0x88] sm:$0xff]  ;;  %v96_v11 = vld [vmem:[%s1913_s2 + $0x178] sm:$0xff]  ;;  %v1137_v12 = vpack.c.bf16 %v94_v4, %v91_v3  ;;  %v99_v3 = vlaneseq  ;;  %s1312_s24 = smov [#allocation2]  }
  0x1c   :  { %1157 = vmatprep.subr.bf16.mxu1 %v1308_v7  ;;  %v93_v10 = vld [vmem:[%s1913_s2 + $0x160] sm:$0xff]  ;;  %v1163_v13 = vpack.c.bf16 %v281_v9, %v280_v6  ;;  %v265_v15 = vld [vmem:[%s1915_s4 + $0x8] sm:$0xff]  ;;  %v282_v17 = vld [vmem:[%s1915_s4 + $0x90] sm:$0xff]  ;;  %s928_s25 = sshll.u32 %s1312_s24, 4  ;;  %s929_s25 = int_to_ptr.vmem [resolvable:$true] %s928_s25 }
  0x1d   :  { %1134 = vmatpush1.bf16.msra.mxu0 %v1133_v1  ;;  %v264_v14 = vld [vmem:[%s1915_s4] sm:$0xff]  ;;  %v1161_v16 = vpack.c.bf16 %v96_v11, %v93_v10  ;;  %v283_v18 = vld [vmem:[%s1915_s4 + $0x98] sm:$0xff]  ;;  %v266_v22 = vld [vmem:[%s1915_s4 + $0x10] sm:$0xff]  ;;  %v100_v4 = vshrl.u32 %v99_v3, 7  ;;  %p1289_p1 = scmp.lt.s32.totalorder %s929_s25, %s929_s25 }
  0x1e   :  { %1136 = vmatprep.subr.bf16.mxu0 %v1135_v2  ;;  %v48_v19 = vld [vmem:[%s1911_s0] sm:$0xff]  ;;  %v1165_v20 = vpack.c.bf16 %v265_v15, %v264_v14  ;;  %v1167_v21 = vpack.c.bf16 %v283_v18, %v282_v17  ;;  %v267_v23 = vld [vmem:[%s1915_s4 + $0x18] sm:$0xff]  ;;  %v285_v25 = vld [vmem:[%s1915_s4 + $0xa8] sm:$0xff] }
  0x1f   :  { %1159 = vmatpush3.bf16.msra.mxu1 %v1158_v5  ;;  %v284_v24 = vld [vmem:[%s1915_s4 + $0xa0] sm:$0xff]  ;;  %v1169_v26 = vpack.c.bf16 %v267_v23, %v266_v22  ;;  %v269_v29 = vld [vmem:[%s1915_s4 + $0x28] sm:$0xff]  ;;  %v286_v30 = vld [vmem:[%s1915_s4 + $0xb0] sm:$0xff]  ;;  %v1660_v5 = vsub.s32 0, %v100_v4  ;;  %v1665_v9 = vsub.s32 1, %v100_v4  ;;  %v109_v10 = vsub.s32 2, %v100_v4 }
  0x20   :  { %1160 = vmatprep.subr.bf16.mxu1 %v1308_v7  ;;  %v1171_v27 = vpack.c.bf16 %v285_v25, %v284_v24  ;;  %v268_v28 = vld [vmem:[%s1915_s4 + $0x20] sm:$0xff]  ;;  %v287_v31 = vld [vmem:[%s1915_s4 + $0xb8] sm:$0xff]  ;;  %v270_v34 = vld [vmem:[%s1915_s4 + $0x30] sm:$0xff] }
  0x21   :  { %1138 = vmatpush1.bf16.msra.mxu0 %v1137_v12  ;;  %v1173_v32 = vpack.c.bf16 %v269_v29, %v268_v28  ;;  %v1175_v33 = vpack.c.bf16 %v287_v31, %v286_v30  ;;  %v271_v35 = vld [vmem:[%s1915_s4 + $0x38] sm:$0xff]  ;;  %v288_v36 = vld [vmem:[%s1915_s4 + $0xc0] sm:$0xff]  ;;  %v289_v37 = vld [vmem:[%s1915_s4 + $0xc8] sm:$0xff] }
  0x22   :  { %1164 = vmatprep.subr.bf16.mxu0 %v1163_v13  ;;  %v1177_v38 = vpack.c.bf16 %v271_v35, %v270_v34  ;;  %v1179_v39 = vpack.c.bf16 %v289_v37, %v288_v36  ;;  %v272_v40 = vld [vmem:[%s1915_s4 + $0x40] sm:$0xff]  ;;  %v273_v41 = vld [vmem:[%s1915_s4 + $0x48] sm:$0xff]  ;;  %v290_v42 = vld [vmem:[%s1915_s4 + $0xd0] sm:$0xff] }
  0x23   :  { %1162 = vmatpush3.bf16.msra.mxu1 %v1161_v16  ;;  %v291_v43 = vld [vmem:[%s1915_s4 + $0xd8] sm:$0xff]  ;;  %v1181_v44 = vpack.c.bf16 %v273_v41, %v272_v40  ;;  %v274_v46 = vld [vmem:[%s1915_s4 + $0x50] sm:$0xff]  ;;  %v292_v49 = vld [vmem:[%s1915_s4 + $0xe0] sm:$0xff] }
  0x24   :  { %179 = vmatmul.mubr.f32.vlgmr.msra.gmra.mrb[0].mxu0 %v48_v19  ;;  %1195 = vmatprep.subr.bf16.mxu1 %v1308_v7  ;;  %v1183_v45 = vpack.c.bf16 %v291_v43, %v290_v42  ;;  %v275_v47 = vld [vmem:[%s1915_s4 + $0x58] sm:$0xff]  ;;  %v293_v50 = vld [vmem:[%s1915_s4 + $0xe8] sm:$0xff]  ;;  %v276_v52 = vld [vmem:[%s1915_s4 + $0x60] sm:$0xff] }
  0x25   :  { %1166 = vmatpush3.bf16.msra.mxu0 %v1165_v20  ;;  %v1185_v48 = vpack.c.bf16 %v275_v47, %v274_v46  ;;  %v1187_v51 = vpack.c.bf16 %v293_v50, %v292_v49  ;;  %v277_v53 = vld [vmem:[%s1915_s4 + $0x68] sm:$0xff]  ;;  %v296_v55 = vld [vmem:[%s1915_s4 + $0x100] sm:$0xff]  ;;  %v294_v58 = vld [vmem:[%s1915_s4 + $0xf0] sm:$0xff] }
  0x26   :  { %1056 = vmatmul.mubr.f32.vlgmr.msra.gmra.mrb[0].mxu1 %v48_v19  ;;  %1168 = vmatprep.subr.bf16.mxu0 %v1167_v21  ;;  %v1189_v54 = vpack.c.bf16 %v277_v53, %v276_v52  ;;  %v297_v56 = vld [vmem:[%s1915_s4 + $0x108] sm:$0xff]  ;;  %v295_v59 = vld [vmem:[%s1915_s4 + $0xf8] sm:$0xff]  ;;  %v278_v61 = vld [vmem:[%s1915_s4 + $0x70] sm:$0xff] }
  0x27   :  { %1066 = vmatprep.mubr.msk.f32.mxu1 %vm1310_vm0, %v1309_v8  ;;  %v1196_v57 = vpack.c.bf16 %v297_v56, %v296_v55  ;;  %v1191_v60 = vpack.c.bf16 %v295_v59, %v294_v58  ;;  %v279_v62 = vld [vmem:[%s1915_s4 + $0x78] sm:$0xff]  ;;  %v298_v0 = vld [vmem:[%s1915_s4 + $0x110] sm:$0xff]  ;;  %v97_v6 = vld [vmem:[%s1914_s3] sm:$0x7] }
  0x28   :  { %v1193_v63 = vpack.c.bf16 %v279_v62, %v278_v61  ;;  %v299_v1 = vld [vmem:[%s1915_s4 + $0x118] sm:$0xff]  ;;  %v102_v11 = vrot.slane %v97_v6, %v1660_v5  ;;  %v106_v12 = vrot.slane %v97_v6, %v1665_v9  ;;  %v110_v13 = vrot.slane %v97_v6, %v109_v10  ;;  %v454_v19 = vld [vmem:[%s1917_s6] sm:$0xff]  ;;  %v455_v20 = vld [vmem:[%s1917_s6 + $0x8] sm:$0xff] }
  0x29   :  { %1170 = vmatpush3.bf16.msra.mxu0 %v1169_v26  ;;  %1197 = vmatpush3.bf16.msra.mxu1 %v1196_v57  ;;  %v1199_v2 = vpack.c.bf16 %v299_v1, %v298_v0  ;;  %v1202_v26 = vpack.c.bf16 %v455_v20, %v454_v19  ;;  %v456_v30 = vld [vmem:[%s1917_s6 + $0x10] sm:$0xff]  ;;  %v457_v31 = vld [vmem:[%s1917_s6 + $0x18] sm:$0xff]  ;;  %v459_v34 = vld [vmem:[%s1917_s6 + $0x28] sm:$0xff] }
  0x2a   :  { %1172 = vmatprep.subr.bf16.mxu0 %v1171_v27  ;;  %1198 = vmatprep.subr.bf16.mxu1 %v1308_v7  ;;  %v460_v36 = vld [vmem:[%s1917_s6 + $0x30] sm:$0xff]  ;;  %v461_v37 = vld [vmem:[%s1917_s6 + $0x38] sm:$0xff]  ;;  %v636_v49 = vld [vmem:[%s1919_s8] sm:$0xff] }
  0x2b   :  { %v639_v40 = vld [vmem:[%s1919_s8 + $0x18] sm:$0xff]  ;;  %v638_v50 = vld [vmem:[%s1919_s8 + $0x10] sm:$0xff]  ;;  %v641_v52 = vld [vmem:[%s1919_s8 + $0x28] sm:$0xff] }
  0x2c   :  { %v643_v53 = vld [vmem:[%s1919_s8 + $0x38] sm:$0xff]  ;;  %v1215_v55 = vpack.c.bf16 %v638_v50, %v636_v49  ;;  %v640_v57 = vld [vmem:[%s1919_s8 + $0x20] sm:$0xff]  ;;  %v642_v58 = vld [vmem:[%s1919_s8 + $0x30] sm:$0xff] }
  0x2d   :  { %1174 = vmatpush3.bf16.msra.mxu0 %v1173_v32  ;;  %1200 = vmatpush3.bf16.msra.mxu1 %v1199_v2  ;;  %v1205_v32 = vpack.c.bf16 %v457_v31, %v456_v30  ;;  %v1217_v56 = vpack.c.bf16 %v643_v53, %v641_v52  ;;  %v647_v61 = vld [vmem:[%s1919_s8 + $0x58] sm:$0xff]  ;;  %v1219_v62 = vpack.c.bf16 %v642_v58, %v640_v57  ;;  %v644_v0 = vld [vmem:[%s1919_s8 + $0x40] sm:$0xff]  ;;  %v646_v1 = vld [vmem:[%s1919_s8 + $0x50] sm:$0xff] }
  0x2e   :  { %1176 = vmatprep.subr.bf16.mxu0 %v1175_v33  ;;  %1201 = vmatprep.subr.bf16.mxu1 %v1308_v7  ;;  %v458_v33 = vld [vmem:[%s1917_s6 + $0x20] sm:$0xff]  ;;  %v1223_v2 = vpack.c.bf16 %v646_v1, %v644_v0  ;;  %v649_v3 = vld [vmem:[%s1919_s8 + $0x68] sm:$0xff]  ;;  %v651_v4 = vld [vmem:[%s1919_s8 + $0x78] sm:$0xff] }
  0x2f   :  { %v1208_v35 = vpack.c.bf16 %v459_v34, %v458_v33  ;;  %v1225_v6 = vpack.c.bf16 %v651_v4, %v649_v3  ;;  %v648_v10 = vld [vmem:[%s1919_s8 + $0x60] sm:$0xff]  ;;  %v730_v19 = vld [vmem:[%s1921_s10 + $0x10] sm:$0xff]  ;;  %v731_v20 = vld [vmem:[%s1921_s10 + $0x18] sm:$0xff] }
  0x30   :  { %v736_v31 = vld [vmem:[%s1921_s10 + $0x40] sm:$0xff]  ;;  %v738_v34 = vld [vmem:[%s1921_s10 + $0x50] sm:$0xff]  ;;  %v836_v0 = vld [vmem:[%s1923_s12 + $0x18] sm:$0xff] }
  0x31   :  { %1178 = vmatpush3.bf16.msra.mxu0 %v1177_v38  ;;  %v1211_v38 = vpack.c.bf16 %v461_v37, %v460_v36  ;;  %v740_v37 = vld [vmem:[%s1921_s10 + $0x60] sm:$0xff]  ;;  %v750_v58 = vld [vmem:[%s1921_s10 + $0xb0] sm:$0xff]  ;;  %v838_v3 = vld [vmem:[%s1923_s12 + $0x28] sm:$0xff] }
  0x32   :  { %1180 = vmatprep.subr.bf16.mxu0 %v1179_v39  ;;  %v637_v39 = vld [vmem:[%s1919_s8 + $0x8] sm:$0xff]  ;;  %v938_v49 = vld [vmem:[%s1918_s7] ss:$0 sm:$0xff] }
  0x33   :  { %v1213_v41 = vpack.c.bf16 %v639_v40, %v637_v39  ;;  %v742_v40 = vld [vmem:[%s1921_s10 + $0x70] sm:$0xff] }
  0x35   :  { %1182 = vmatpush3.bf16.msra.mxu0 %v1181_v44 }
  0x36   :  { %1184 = vmatprep.subr.bf16.mxu0 %v1183_v45  ;;  %v936_v45 = vld [vmem:[%s1916_s5] ss:$0 sm:$0xff] }
  0x39   :  { %1186 = vmatpush3.bf16.msra.mxu0 %v1185_v48 }
  0x3a   :  { %1188 = vmatprep.subr.bf16.mxu0 %v1187_v51 }
  0x3d   :  { %1190 = vmatpush3.bf16.msra.mxu0 %v1189_v54 }
  0x3e   :  { %1192 = vmatprep.subr.bf16.mxu0 %v1191_v60  ;;  %v645_v60 = vld [vmem:[%s1919_s8 + $0x48] sm:$0xff] }
  0x41   :  { %1194 = vmatpush3.bf16.msra.mxu0 %v1193_v63  ;;  %v1221_v63 = vpack.c.bf16 %v647_v61, %v645_v60  ;;  %v833_v60 = vld [vmem:[%s1923_s12] sm:$0xff]  ;;  %v834_v61 = vld [vmem:[%s1923_s12 + $0x8] sm:$0xff] }
  0x42   :  { %1229 = vmatprep.subr.bf16.mxu0 %v1308_v7 }
  0xf7   :  { %v180_v14 = vpop.f32.mrb[0].mxu0 }
  0xf8   :  { %v181_v15 = vadd.f32 %v180_v14, %v102_v11  ;;  %v182_v16 = vpop.f32.mrb[1].mxu0  ;;  %v650_v11 = vld [vmem:[%s1919_s8 + $0x70] sm:$0xff]  ;;  %v728_v14 = vld [vmem:[%s1921_s10] sm:$0xff] }
  0xf9   :  { %v183_v17 = vadd.f32 %v182_v16, %v106_v12  ;;  %v251_v18 = vpop.f32.mrb[0].mxu1  ;;  %v1227_v12 = vpack.c.bf16 %v650_v11, %v648_v10  ;;  %v1311_v16 = vmov 0   ;;  %v548_v10 = vld [vmem:[%s1920_s9] ss:$4 sm:$0x3] }
  0xfa   :  { %v258_v21 = vmul.f32 0.01, %v181_v15  ;;  %v252_v22 = vadd.f32 %v251_v18, %v110_v13  ;;  %v1057_v23 = vpop.f32.mrb[1].mxu1  ;;  %vm255_vm1 = vcmp.gt.f32.partialorder %v181_v15, 0.0  ;;  %v546_v13 = vld [vmem:[%s1912_s1] sm:$0xff]  ;;  %1282 = vset.pattern.permute.xlu0 %v1311_v16  ;;  %1283 = vset.pattern.permute.xlu1 %v1311_v16 }
  0xfb   :  { %v259_v24 = vmul.f32 0.01, %v183_v17  ;;  %vm256_vm2 = vcmp.gt.f32.partialorder %v183_v17, 0.0  ;;  %vm547_vm7 = vcmp.eq.s32.totalorder %v546_v13, 0  ;;  %vm590_vm8 = vcmp.eq.s32.totalorder %v546_v13, 2 }
  0xfc   :  { %vm257_vm3 = vcmp.gt.f32.partialorder %v252_v22, 0.0  ;;  %v260_v25 = vmul.f32 0.01, %v252_v22  ;;  %v261_v29 = vsel %vm255_vm1, %v181_v15, %v258_v21  ;;  %v729_v15 = vld [vmem:[%s1921_s10 + $0x8] sm:$0xff]  ;;  %vm567_vm9 = vcmp.eq.s32.totalorder %v546_v13, 1 }
  0xfd   :  { %v262_v27 = vsel %vm256_vm2, %v183_v17, %v259_v24  ;;  %vm613_vm10 = vcmp.eq.s32.totalorder %v546_v13, 3  ;;  %v549_v17 = vsel %vm547_vm7, 1, %v1311_v16  ;;  %v593_v18 = vsel %vm590_vm8, 1, %v1311_v16  ;;  %v940_v11 = vld [vmem:[%s1920_s9 + $0x1] ss:$4 sm:$0x3] }
  0xfe   :  { %v263_v28 = vsel %vm257_vm3, %v252_v22, %v260_v25  ;;  %375 = vmatprep.mubr.f32.mxu0 %v262_v27  ;;  %551 = vperm.xlu0 %1282, %v549_v17   ;;  %v1230_v21 = vpack.c.bf16 %v729_v15, %v728_v14  ;;  %v570_v22 = vsel %vm567_vm9, 1, %v1311_v16  ;;  %v616_v23 = vsel %vm613_vm10, 1, %v1311_v16  ;;  %v732_v25 = vld [vmem:[%s1921_s10 + $0x20] sm:$0xff] }
  0xff   :  { %376 = vmatmul.mubr.f32.vlgmr.msra.gmra.mrb[2].mxu0 %v261_v29  ;;  %1067 = vmatmul.mubr.msk.f32.vlgmr.msra.gmra.mrb[2].mxu1 %vm307_vm4, %v263_v28  ;;  %v1233_v24 = vpack.c.bf16 %v731_v20, %v730_v19  ;;  %v734_v28 = vld [vmem:[%s1921_s10 + $0x30] sm:$0xff]  ;;  %v735_v29 = vld [vmem:[%s1921_s10 + $0x38] sm:$0xff]  ;;  %v558_v13 = vrot.slane %v548_v10, %v1660_v5  ;;  %v579_v15 = vrot.slane %v940_v11, %v1660_v5 }
 0x100   :  { %1203 = vmatpush3.bf16.msra.mxu1 %v1202_v26  ;;  %1085 = vmatprep.mubr.msk.f32.mxu1 %vm1310_vm0, %v1309_v8  ;;  %v733_v26 = vld [vmem:[%s1921_s10 + $0x28] sm:$0xff]  ;;  %v1239_v30 = vpack.c.bf16 %v735_v29, %v734_v28  ;;  %v562_v16 = vrot.slane %v548_v10, %v1665_v9  ;;  %v583_v17 = vrot.slane %v940_v11, %v1665_v9 }
 0x101   :  { %1204 = vmatprep.subr.bf16.mxu1 %v1308_v7  ;;  %595 = vperm.xlu1 %1283, %v593_v18   ;;  %v1236_v27 = vpack.c.bf16 %v733_v26, %v732_v25 }
 0x102   :  { %1231 = vmatpush1.bf16.msra.mxu0 %v1230_v21  ;;  %572 = vperm.xlu0 %1282, %v570_v22  }
 0x103   :  { %1232 = vmatprep.subr.bf16.mxu0 %v1308_v7 }
 0x104   :  { %1206 = vmatpush3.bf16.msra.mxu1 %v1205_v32  ;;  %v737_v32 = vld [vmem:[%s1921_s10 + $0x48] sm:$0xff] }
 0x105   :  { %1207 = vmatprep.subr.bf16.mxu1 %v1308_v7  ;;  %618 = vperm.xlu1 %1283, %v616_v23   ;;  %v1242_v33 = vpack.c.bf16 %v737_v32, %v736_v31 }
 0x106   :  { %1234 = vmatpush1.bf16.msra.mxu0 %v1233_v24  ;;  %v942_v24 = vld [vmem:[%s1920_s9 + $0x3] ss:$4 sm:$0x3] }
 0x107   :  { %1235 = vmatprep.subr.bf16.mxu0 %v1308_v7  ;;  %v625_v29 = vrot.slane %v942_v24, %v1660_v5  ;;  %v629_v31 = vrot.slane %v942_v24, %v1665_v9 }
 0x108   :  { %1209 = vmatpush3.bf16.msra.mxu1 %v1208_v35  ;;  %v739_v35 = vld [vmem:[%s1921_s10 + $0x58] sm:$0xff] }
 0x109   :  { %1210 = vmatprep.subr.bf16.mxu1 %v1308_v7  ;;  %v1245_v36 = vpack.c.bf16 %v739_v35, %v738_v34 }
 0x10a   :  { %1237 = vmatpush1.bf16.msra.mxu0 %v1236_v27 }
 0x10b   :  { %1238 = vmatprep.subr.bf16.mxu0 %v1308_v7 }
 0x10c   :  { %1212 = vmatpush3.bf16.msra.mxu1 %v1211_v38  ;;  %v741_v38 = vld [vmem:[%s1921_s10 + $0x68] sm:$0xff] }
 0x10d   :  { %1214 = vmatprep.subr.bf16.mxu1 %v1213_v41  ;;  %v1248_v39 = vpack.c.bf16 %v741_v38, %v740_v37  ;;  %v743_v41 = vld [vmem:[%s1921_s10 + $0x78] sm:$0xff] }
 0x10e   :  { %1240 = vmatpush1.bf16.msra.mxu0 %v1239_v30 }
 0x10f   :  { %1241 = vmatprep.subr.bf16.mxu0 %v1308_v7 }
 0x112   :  { %1243 = vmatpush1.bf16.msra.mxu0 %v1242_v33 }
 0x113   :  { %1244 = vmatprep.subr.bf16.mxu0 %v1308_v7 }
 0x116   :  { %1246 = vmatpush1.bf16.msra.mxu0 %v1245_v36 }
 0x117   :  { %1247 = vmatprep.subr.bf16.mxu0 %v1308_v7 }
 0x11a   :  { %1249 = vmatpush1.bf16.msra.mxu0 %v1248_v39 }
 0x11b   :  { %1250 = vmatprep.subr.bf16.mxu0 %v1308_v7 }
 0x180   :  { %v596_v14 = vpop.permute.xlu1 %595 }
 0x181   :  { %vm597_vm14 = vcmp.eq.s32.totalorder %v596_v14, 1 }
 0x184   :  { %v619_v25 = vpop.permute.xlu1 %618 }
 0x185   :  { %vm620_vm15 = vcmp.eq.s32.totalorder %v619_v25, 1 }
 0x186   :  { %v632_v34 = vsel %vm620_vm15, %v625_v29, 0.0  ;;  %v633_v35 = vsel %vm620_vm15, %v629_v31, 0.0 }
 0x1d2   :  { %v997_v42 = vpop.f32.mrb[2].mxu0  ;;  %v447_v43 = vpop.f32.mrb[2].mxu1 }
 0x1d3   :  { %v998_v44 = vpop.f32.mrb[3].mxu0  ;;  %v1068_v46 = vpop.f32.mrb[3].mxu1 }
 0x1d4   :  { %v999_v47 = vadd.f32 %v998_v44, %v997_v42  ;;  %v1251_v42 = vpack.c.bf16 %v743_v41, %v742_v40  ;;  %v745_v44 = vld [vmem:[%s1921_s10 + $0x88] sm:$0xff]  ;;  %v746_v46 = vld [vmem:[%s1921_s10 + $0x90] sm:$0xff] }
 0x1d6   :  { %v378_v48 = vadd.f32 %v999_v47, %v936_v45  ;;  %1252 = vmatpush1.bf16.msra.mxu0 %v1251_v42  ;;  %v747_v47 = vld [vmem:[%s1921_s10 + $0x98] sm:$0xff] }
 0x1d7   :  { %1253 = vmatprep.subr.bf16.mxu0 %v1308_v7 }
 0x1d8   :  { %v448_v51 = vadd.f32 %v447_v43, %v378_v48  ;;  %v744_v43 = vld [vmem:[%s1921_s10 + $0x80] sm:$0xff]  ;;  %v1257_v48 = vpack.c.bf16 %v747_v47, %v746_v46 }
 0x1d9   :  { %v1254_v45 = vpack.c.bf16 %v745_v44, %v744_v43 }
 0x1da   :  { %vm451_vm5 = vcmp.gt.f32.partialorder %v448_v51, 0.0  ;;  %v452_v54 = vmul.f32 0.01, %v448_v51 }
 0x1db   :  { %1255 = vmatpush1.bf16.msra.mxu0 %v1254_v45  ;;  %v944_v45 = vld [vmem:[%s1922_s11] ss:$0 sm:$0xff] }
 0x1dc   :  { %v453_v59 = vsel %vm451_vm5, %v448_v51, %v452_v54  ;;  %1256 = vmatprep.subr.bf16.mxu0 %v1308_v7 }
 0x1dd   :  { %1086 = vmatmul.mubr.msk.f32.vlgmr.msra.gmra.mrb[4].mxu1 %vm469_vm6, %v453_v59 }
 0x1de   :  { %1216 = vmatpush1.bf16.msra.mxu1 %v1215_v55  ;;  %719 = vmatprep.mubr.f32.mxu1 %v1309_v8  ;;  %v748_v55 = vld [vmem:[%s1921_s10 + $0xa0] sm:$0xff] }
 0x1df   :  { %1218 = vmatprep.subr.bf16.mxu1 %v1217_v56  ;;  %1258 = vmatpush1.bf16.msra.mxu0 %v1257_v48  ;;  %v749_v56 = vld [vmem:[%s1921_s10 + $0xa8] sm:$0xff] }
 0x1e0   :  { %1259 = vmatprep.subr.bf16.mxu0 %v1308_v7  ;;  %v1260_v57 = vpack.c.bf16 %v749_v56, %v748_v55 }
 0x1e2   :  { %1220 = vmatpush1.bf16.msra.mxu1 %v1219_v62  ;;  %v835_v62 = vld [vmem:[%s1923_s12 + $0x10] sm:$0xff] }
 0x1e3   :  { %1222 = vmatprep.subr.bf16.mxu1 %v1221_v63  ;;  %1261 = vmatpush1.bf16.msra.mxu0 %v1260_v57  ;;  %v1266_v63 = vpack.c.bf16 %v834_v61, %v833_v60  ;;  %v1269_v1 = vpack.c.bf16 %v836_v0, %v835_v62 }
 0x1e4   :  { %1262 = vmatprep.subr.bf16.mxu0 %v1308_v7 }
 0x1e6   :  { %1224 = vmatpush1.bf16.msra.mxu1 %v1223_v2  ;;  %v837_v2 = vld [vmem:[%s1923_s12 + $0x20] sm:$0xff] }
 0x1e7   :  { %1226 = vmatprep.subr.bf16.mxu1 %v1225_v6  ;;  %v1272_v4 = vpack.c.bf16 %v838_v3, %v837_v2  ;;  %v552_v6 = vpop.permute.xlu0 %551 }
 0x1e8   :  { %vm553_vm12 = vcmp.eq.s32.totalorder %v552_v6, 1 }
 0x1e9   :  { %v565_v18 = vsel %vm553_vm12, %v558_v13, 0.0  ;;  %v566_v21 = vsel %vm553_vm12, %v562_v16, 0.0 }
 0x1ea   :  { %1228 = vmatpush1.bf16.msra.mxu1 %v1227_v12 }
 0x1eb   :  { %1265 = vmatprep.subr.bf16.mxu1 %v1308_v7  ;;  %v573_v12 = vpop.permute.xlu0 %572 }
 0x1ec   :  { %vm574_vm13 = vcmp.eq.s32.totalorder %v573_v12, 1 }
 0x1ed   :  { %v586_v20 = vsel %vm574_vm13, %v579_v15, 0.0  ;;  %v587_v23 = vsel %vm574_vm13, %v583_v17, 0.0 }
 0x1ee   :  { %v588_v26 = vadd.f32 %v586_v20, %v565_v18  ;;  %v589_v28 = vadd.f32 %v587_v23, %v566_v21 }
 0x2b0   :  { %v539_v50 = vpop.f32.mrb[4].mxu1 }
 0x2b1   :  { %v540_v51 = vadd.f32 %v938_v49, %v539_v50  ;;  %v1087_v52 = vpop.f32.mrb[5].mxu1  ;;  %v946_v50 = vld [vmem:[%s1924_s13] ss:$0 sm:$0xff] }
 0x2b3   :  { %vm543_vm11 = vcmp.gt.f32.partialorder %v540_v51, 0.0  ;;  %v544_v53 = vmul.f32 0.01, %v540_v51 }
 0x2b5   :  { %v545_v54 = vsel %vm543_vm11, %v540_v51, %v544_v53 }
 0x2b6   :  { %943 = vmatmul.mubr.msk.f32.vlgmr.msra.gmra.mrb[6].mxu1 %vm469_vm6, %v545_v54 }
 0x2b7   :  { %1104 = vmatprep.mubr.msk.f32.mxu1 %vm1310_vm0, %v1309_v8  ;;  %v751_v8 = vld [vmem:[%s1921_s10 + $0xb8] sm:$0xff]  ;;  %1267 = vmatpush3.bf16.msra.mxu1 %v1266_v63 }
 0x2b8   :  { %v1263_v59 = vpack.c.bf16 %v751_v8, %v750_v58  ;;  %1268 = vmatprep.subr.bf16.mxu1 %v1308_v7 }
 0x2ba   :  { %1264 = vmatpush1.bf16.msra.mxu0 %v1263_v59 }
 0x2bb   :  { %1270 = vmatpush3.bf16.msra.mxu1 %v1269_v1 }
 0x2bc   :  { %1271 = vmatprep.subr.bf16.mxu1 %v1308_v7 }
 0x2bf   :  { %1273 = vmatpush3.bf16.msra.mxu1 %v1272_v4 }
 0x2c0   :  { %1274 = vmatprep.subr.bf16.mxu1 %v1308_v7  ;;  %v941_v7 = vld [vmem:[%s1920_s9 + $0x2] ss:$4 sm:$0x3] }
 0x2c1   :  { %v602_v19 = vrot.slane %v941_v7, %v1660_v5  ;;  %v606_v22 = vrot.slane %v941_v7, %v1665_v9  ;;  %v839_v5 = vld [vmem:[%s1923_s12 + $0x30] sm:$0xff]  ;;  %v840_v9 = vld [vmem:[%s1923_s12 + $0x38] sm:$0xff]  ;;  %s1284_s12 = scalar_lea.vmem %s929_s25, 128 }
 0x2c2   :  { %v1275_v44 = vpack.c.bf16 %v840_v9, %v839_v5  ;;  %p1285_p0 = scmp.ne.s32.totalorder %s929_s25, %s1284_s12  ;;  %p1290_p2 = scmp.lt.s32.totalorder %s1284_s12, %s1284_s12 }
 0x2c3   :  { %v609_v27 = vsel %vm597_vm14, %v602_v19, 0.0  ;;  %v610_v30 = vsel %vm597_vm14, %v606_v22, 0.0 }
 0x2c4   :  { %v611_v32 = vadd.f32 %v609_v27, %v588_v26  ;;  %v612_v33 = vadd.f32 %v610_v30, %v589_v28  ;;  %1276 = vmatpush3.bf16.msra.mxu1 %v1275_v44  ;;  %p1291_p3 = por %p1290_p2, %p1289_p1 }
 0x2c6   :  { %v634_v36 = vadd.f32 %v632_v34, %v611_v32  ;;  %v635_v37 = vadd.f32 %v633_v35, %v612_v33  ;;  %p1292_p4 = pnand %p1291_p3, %p1285_p0 }
 0x389   :  { %v721_v38 = vpop.f32.mrb[6].mxu1 }
 0x38a   :  { %v722_v39 = vadd.f32 %v721_v38, %v634_v36  ;;  %v723_v40 = vpop.f32.mrb[7].mxu1 }
 0x38b   :  { %v724_v41 = vadd.f32 %v723_v40, %v635_v37 }
 0x38c   :  { %v726_v43 = vmax.f32 %v722_v39, 0.0 }
 0x38d   :  { %v727_v42 = vmax.f32 %v724_v41, 0.0 }
 0x38f   :  { %945 = vmatprep.mubr.msk.f32.mxu0 %vm469_vm6, %v727_v42 }
 0x390   :  { %827 = vmatmul.mubr.f32.vlgmr.msra.gmra.mrb[4].mxu0 %v726_v43 }
 0x463   :  { %v828_v46 = vpop.f32.mrb[4].mxu0 }
 0x464   :  { %v829_v47 = vadd.f32 %v944_v45, %v828_v46  ;;  %v830_v48 = vpop.f32.mrb[5].mxu0 }
 0x466   :  { %v832_v49 = vmax.f32 %v829_v47, 0.0 }
 0x468   :  { %1105 = vmatmul.mubr.msk.f32.vlgmr.msra.gmra.mrb[8].mxu1 %vm469_vm6, %v832_v49 }
 0x53b   :  { %v917_v51 = vpop.f32.mrb[8].mxu1 }
 0x53c   :  { %v918_v52 = vadd.f32 %v946_v50, %v917_v51  ;;  %v1106_v53 = vpop.f32.mrb[9].mxu1 }
 0x53e   :  { %921 = vst [vmem:[#allocation2] sm:$0xff] %v918_v52 }
 0x53f   :  { %1295 = shalt.err (!%p1292_p4)
}
 0x540   :  { %s1296_s26 = scalar_lea.hbm %s1925_s14, 128 }
 0x541   :  { %p1297_p5 = scmp.ne.s32.totalorder %s1925_s14, %s1296_s26  ;;  %p1300_p6 = scmp.lt.u32.totalorder %s1296_s26, %s1925_s14 }
 0x543   :  { %p1302_p7 = pnand %p1300_p6, %p1297_p5 }
 0x545   :  { %1305 = shalt.err (!%p1302_p7)
}
 0x546   :  { %931 = dma.vmem_to_hbm [thread:$0]  %s929_s25, 128, %s1925_s14, [#allocation3]  }
 0x547   :  { %1306 = dma.done.wait [#allocation3], 128  }
 0x548   :  { %1307 = vsyncadd [#allocation3], 4294967168 }
 0x549   :  { %935 = vsyncpa [#allocation3], 1 }

</bundles_post_ra>
